<compile_context>
chip_gen: v5e
topology: v5e:2x2
jax: 0.10.0
libtpu: 0.0.40
codegen_flags: <defaults>
</compile_context>

<pallas_src>
import numpy as np
import jax
import jax.numpy as jnp
from jax.experimental import pallas as pl
from jax.experimental.pallas import tpu as pltpu


def warped_kernel(x_ref, o_ref):
    # x_ref: (TM, D) tile;  o_ref: (TM, 3) tile.
    x = x_ref[...]
    o_ref[...] = x[:, 3:6] - x[:, 0:3]


def warped_forward(x, *, tile_rows=512):
    """out = x[..., 3:6] - x[..., 0:3], computed by a Pallas TPU kernel."""
    orig_shape = x.shape
    D = int(orig_shape[-1])
    assert D >= 6, "last dim must have at least 6 channels"

    # Flatten all leading dims into a single row axis.
    M = 1
    for s in orig_shape[:-1]:
        M *= int(s)
    x2 = x.reshape(M, D)

    # Row tile: multiple of 8 (sublanes) when tiling, or the full row count
    # for a single block.  512 rows x D floats is tiny vs. any VMEM budget
    # while still amortizing the ~0.35 us per-step pipeline overhead.
    TM = M if M <= tile_rows else tile_rows
    grid = (pl.cdiv(M, TM),)

    out = pl.pallas_call(
        warped_kernel,
        out_shape=jax.ShapeDtypeStruct((M, 3), x.dtype),
        grid=grid,
        in_specs=[pl.BlockSpec((TM, D), lambda i: (i, 0))],
        out_specs=pl.BlockSpec((TM, 3), lambda i: (i, 0)),
        compiler_params=pltpu.CompilerParams(
            dimension_semantics=("parallel",)),  # megacore-friendly on v7x
    )(x2)
    return out.reshape(orig_shape[:-1] + (3,))


def warped_reference(x):
    return x[..., 3:6] - x[..., 0:3]


if __name__ == "__main__":
    key = jax.random.PRNGKey(0)
    k1, k2 = jax.random.split(key)

    # Primary small test: (batch=2, points=128, channels=6) -> single block.
    x1 = jax.random.normal(k1, (2, 128, 6), dtype=jnp.float32)
    out1 = jax.block_until_ready(warped_forward(x1))
    np.testing.assert_allclose(
        np.asarray(out1), np.asarray(warped_reference(x1)), rtol=1e-6, atol=1e-6)

    # Secondary test: extra channels (D=8) and enough rows to exercise the
    # tiled, pipelined grid (M = 2*1024 = 2048 rows, TM = 512, grid = 4).
    x2 = jax.random.normal(k2, (2, 1024, 8), dtype=jnp.float32)
    out2 = jax.block_until_ready(warped_forward(x2))
    np.testing.assert_allclose(
        np.asarray(out2), np.asarray(warped_reference(x2)), rtol=1e-6, atol=1e-6)

    print("KERNEL_OK")
</pallas_src>

<mosaic_0001>
module attributes {stable_mosaic.version = 11 : i64} {
  func.func @warped_kernel(%arg0: i32, %arg1: memref<256x6xf32, #tpu.memory_space<vmem>>, %arg2: memref<256x3xf32, #tpu.memory_space<vmem>>) attributes {dimension_semantics = [#tpu.dimension_semantics<parallel>], iteration_bounds = array<i64: 1>, scalar_prefetch = 0 : i64, scratch_operands = 0 : i64, tpu.core_type = #tpu.core_type<tc>, window_params = [{transform_indices = @transform_0, window_bounds = array<i64: 256, 6>}, {transform_indices = @transform_1, window_bounds = array<i64: 256, 3>}]} {
    %c0 = arith.constant 0 : index
    %c0_0 = arith.constant 0 : index
    %0 = vector.load %arg1[%c0, %c0_0] : memref<256x6xf32, #tpu.memory_space<vmem>>, vector<256x6xf32>
    %1 = vector.extract_strided_slice %0 {offsets = [0, 3], sizes = [256, 3], strides = [1, 1]} : vector<256x6xf32> to vector<256x3xf32>
    %2 = vector.extract_strided_slice %0 {offsets = [0, 0], sizes = [256, 3], strides = [1, 1]} : vector<256x6xf32> to vector<256x3xf32>
    %3 = arith.subf %1, %2 : vector<256x3xf32>
    %c0_1 = arith.constant 0 : index
    %c0_2 = arith.constant 0 : index
    %4 = vector.load %arg2[%c0_1, %c0_2] : memref<256x3xf32, #tpu.memory_space<vmem>>, vector<256x3xf32>
    tpu.vector_store %arg2[%c0_1, %c0_2], %3 {strides = array<i32>} : memref<256x3xf32, #tpu.memory_space<vmem>>, vector<256x3xf32>,
    return
  }
  func.func @transform_0(%arg0: i32) -> (i32, i32) {
    %c0_i32 = arith.constant 0 : i32
    %c0_i32_0 = arith.constant 0 : i32
    return %arg0, %c0_i32 : i32, i32
  }
  func.func @transform_1(%arg0: i32) -> (i32, i32) {
    %c0_i32 = arith.constant 0 : i32
    %c0_i32_0 = arith.constant 0 : i32
    return %arg0, %c0_i32 : i32, i32
  }
}

</mosaic_0001>

<bundles_post_ra>
// kernel: tpu_custom_call.1
= control target key start
LH: loop header
LB: loop body
LE: loop exit
PB: predicated region body
PF: predicated region fallthrough
CT: control target
= control target key end

     0   :  { %s367_s10 = smov 3   ;;  %s368_s15 = smov 125   ;;  %vm328_vm0 = vcmask 23552   ;;  %s795_s0 = inlined_call_operand.vmem [shape: f32[256,6], index: 0, kind: input, shape index: {}]   ;;  %s796_s1 = inlined_call_operand.vmem [shape: f32[256,3], index: 1, kind: output, shape index: {}]  }
   0x1   :  { %v382_v0 = vld [vmem:[%s795_s0] sm:$0xff]  ;;  %v387_v1 = vld [vmem:[%s795_s0 + $0x10] sm:$0xff]  ;;  %v403_v3 = vld [vmem:[%s795_s0 + $0x8] sm:$0xff] }
   0x2   :  { %72 = vrot.lane.b32.xlu0 %v382_v0, %s367_s10  ;;  %76 = vrot.lane.b32.xlu1 %v387_v1, %s367_s10  ;;  %v396_v2 = vld [vmem:[%s795_s0 + $0x20] sm:$0xff]  ;;  %v408_v4 = vld [vmem:[%s795_s0 + $0x18] sm:$0xff] }
   0x3   :  { %80 = vrot.lane.b32.xlu2 %v396_v2, %s367_s10  ;;  %v413_v5 = vld [vmem:[%s795_s0 + $0x28] sm:$0xff]  ;;  %v424_v6 = vld [vmem:[%s795_s0 + $0x38] sm:$0xff]  ;;  %v429_v7 = vld [vmem:[%s795_s0 + $0x30] sm:$0xff] }
   0x4   :  { %v434_v8 = vld [vmem:[%s795_s0 + $0x40] sm:$0xff]  ;;  %v445_v9 = vld [vmem:[%s795_s0 + $0x50] sm:$0xff]  ;;  %v450_v10 = vld [vmem:[%s795_s0 + $0x48] sm:$0xff] }
   0x5   :  { %v455_v11 = vld [vmem:[%s795_s0 + $0x58] sm:$0xff]  ;;  %v466_v12 = vld [vmem:[%s795_s0 + $0x68] sm:$0xff]  ;;  %v471_v13 = vld [vmem:[%s795_s0 + $0x60] sm:$0xff] }
   0x6   :  { %v476_v14 = vld [vmem:[%s795_s0 + $0x70] sm:$0xff]  ;;  %v487_v15 = vld [vmem:[%s795_s0 + $0x80] sm:$0xff]  ;;  %v492_v16 = vld [vmem:[%s795_s0 + $0x78] sm:$0xff] }
   0x7   :  { %v497_v17 = vld [vmem:[%s795_s0 + $0x88] sm:$0xff]  ;;  %v508_v18 = vld [vmem:[%s795_s0 + $0x98] sm:$0xff]  ;;  %v513_v19 = vld [vmem:[%s795_s0 + $0x90] sm:$0xff] }
   0x8   :  { %v518_v20 = vld [vmem:[%s795_s0 + $0xa0] sm:$0xff]  ;;  %v529_v21 = vld [vmem:[%s795_s0 + $0xb0] sm:$0xff]  ;;  %v534_v22 = vld [vmem:[%s795_s0 + $0xa8] sm:$0xff] }
   0x9   :  { %v539_v23 = vld [vmem:[%s795_s0 + $0xb8] sm:$0xff]  ;;  %v550_v24 = vld [vmem:[%s795_s0 + $0xc8] sm:$0xff]  ;;  %v555_v25 = vld [vmem:[%s795_s0 + $0xc0] sm:$0xff] }
   0xa   :  { %74 = vrot.lane.b32.xlu0 %v403_v3, %s367_s10  ;;  %78 = vrot.lane.b32.xlu1 %v408_v4, %s367_s10  ;;  %v560_v26 = vld [vmem:[%s795_s0 + $0xd0] sm:$0xff]  ;;  %v571_v27 = vld [vmem:[%s795_s0 + $0xe0] sm:$0xff] }
   0xb   :  { %82 = vrot.lane.b32.xlu2 %v413_v5, %s367_s10  ;;  %v576_v28 = vld [vmem:[%s795_s0 + $0xd8] sm:$0xff]  ;;  %v581_v29 = vld [vmem:[%s795_s0 + $0xe8] sm:$0xff]  ;;  %v597_v31 = vld [vmem:[%s795_s0 + $0xf0] sm:$0xff] }
   0xc   :  { %v592_v30 = vld [vmem:[%s795_s0 + $0xf8] sm:$0xff] }
  0x12   :  { %86 = vrot.lane.b32.xlu1 %v424_v6, %s367_s10  ;;  %84 = vrot.lane.b32.xlu0 %v429_v7, %s367_s10 }
  0x13   :  { %88 = vrot.lane.b32.xlu2 %v434_v8, %s367_s10 }
  0x1a   :  { %92 = vrot.lane.b32.xlu1 %v445_v9, %s367_s10  ;;  %90 = vrot.lane.b32.xlu0 %v450_v10, %s367_s10 }
  0x1b   :  { %94 = vrot.lane.b32.xlu2 %v455_v11, %s367_s10 }
  0x22   :  { %98 = vrot.lane.b32.xlu1 %v466_v12, %s367_s10  ;;  %96 = vrot.lane.b32.xlu0 %v471_v13, %s367_s10 }
  0x23   :  { %100 = vrot.lane.b32.xlu2 %v476_v14, %s367_s10 }
  0x2a   :  { %104 = vrot.lane.b32.xlu1 %v487_v15, %s367_s10  ;;  %102 = vrot.lane.b32.xlu0 %v492_v16, %s367_s10 }
  0x2b   :  { %106 = vrot.lane.b32.xlu2 %v497_v17, %s367_s10 }
  0x32   :  { %110 = vrot.lane.b32.xlu1 %v508_v18, %s367_s10  ;;  %108 = vrot.lane.b32.xlu0 %v513_v19, %s367_s10 }
  0x33   :  { %112 = vrot.lane.b32.xlu2 %v518_v20, %s367_s10 }
  0x3a   :  { %116 = vrot.lane.b32.xlu1 %v529_v21, %s367_s10  ;;  %114 = vrot.lane.b32.xlu0 %v534_v22, %s367_s10 }
  0x3b   :  { %118 = vrot.lane.b32.xlu2 %v539_v23, %s367_s10 }
  0x42   :  { %122 = vrot.lane.b32.xlu1 %v550_v24, %s367_s10  ;;  %120 = vrot.lane.b32.xlu0 %v555_v25, %s367_s10 }
  0x43   :  { %124 = vrot.lane.b32.xlu2 %v560_v26, %s367_s10 }
  0x4a   :  { %128 = vrot.lane.b32.xlu1 %v571_v27, %s367_s10  ;;  %126 = vrot.lane.b32.xlu0 %v576_v28, %s367_s10 }
  0x4b   :  { %130 = vrot.lane.b32.xlu2 %v581_v29, %s367_s10 }
  0x52   :  { %134 = vrot.lane.b32.xlu1 %v592_v30, %s367_s10  ;;  %132 = vrot.lane.b32.xlu0 %v597_v31, %s367_s10 }
  0x5d   :  { %v81_v32 = vpop.permute.xlu2 %80 }
  0x5e   :  { %v172_v45 = vsub.f32 %v396_v2, %v81_v32 }
  0x65   :  { %v83_v33 = vpop.permute.xlu2 %82 }
  0x66   :  { %v173_v41 = vsub.f32 %v413_v5, %v83_v33 }
  0x6d   :  { %v89_v38 = vpop.permute.xlu2 %88 }
  0x6e   :  { %v176_v47 = vsub.f32 %v434_v8, %v89_v38 }
  0x74   :  { %v73_v34 = vpop.permute.xlu0 %72  ;;  %v77_v35 = vpop.permute.xlu1 %76 }
  0x75   :  { %v168_v36 = vsub.f32 %v382_v0, %v73_v34  ;;  %v170_v37 = vsub.f32 %v387_v1, %v77_v35  ;;  %v95_v44 = vpop.permute.xlu2 %94 }
  0x76   :  { %v179_v53 = vsub.f32 %v455_v11, %v95_v44 }
  0x77   :  { %232 = vrot.lane.b32.xlu2 %v168_v36, %s368_s15  ;;  %236 = vrot.lane.b32.xlu1 %v170_v37, %s368_s15 }
  0x7c   :  { %v75_v39 = vpop.permute.xlu0 %74  ;;  %v79_v40 = vpop.permute.xlu1 %78 }
  0x7d   :  { %v169_v42 = vsub.f32 %v403_v3, %v75_v39  ;;  %v171_v43 = vsub.f32 %v408_v4, %v79_v40  ;;  %v101_v50 = vpop.permute.xlu2 %100 }
  0x7e   :  { %v182_v59 = vsub.f32 %v476_v14, %v101_v50 }
  0x7f   :  { %234 = vrot.lane.b32.xlu0 %v169_v42, %s368_s15  ;;  %238 = vrot.lane.b32.xlu2 %v171_v43, %s368_s15 }
  0x80   :  { %242 = vrot.lane.b32.xlu1 %v173_v41, %s368_s15 }
  0x84   :  { %v87_v46 = vpop.permute.xlu1 %86  ;;  %v85_v48 = vpop.permute.xlu0 %84 }
  0x85   :  { %v174_v49 = vsub.f32 %v429_v7, %v85_v48  ;;  %v175_v51 = vsub.f32 %v424_v6, %v87_v46  ;;  %v107_v57 = vpop.permute.xlu2 %106 }
  0x86   :  { %v185_v0 = vsub.f32 %v497_v17, %v107_v57 }
  0x87   :  { %240 = vrot.lane.b32.xlu0 %v172_v45, %s368_s15  ;;  %244 = vrot.lane.b32.xlu2 %v174_v49, %s368_s15 }
  0x88   :  { %248 = vrot.lane.b32.xlu1 %v176_v47, %s368_s15 }
  0x8c   :  { %v93_v52 = vpop.permute.xlu1 %92  ;;  %v91_v54 = vpop.permute.xlu0 %90 }
  0x8d   :  { %v177_v55 = vsub.f32 %v450_v10, %v91_v54  ;;  %v178_v56 = vsub.f32 %v445_v9, %v93_v52  ;;  %v113_v2 = vpop.permute.xlu2 %112 }
  0x8e   :  { %v188_v6 = vsub.f32 %v518_v20, %v113_v2 }
  0x8f   :  { %246 = vrot.lane.b32.xlu0 %v175_v51, %s368_s15  ;;  %250 = vrot.lane.b32.xlu2 %v177_v55, %s368_s15 }
  0x90   :  { %254 = vrot.lane.b32.xlu1 %v179_v53, %s368_s15 }
  0x94   :  { %v99_v58 = vpop.permute.xlu1 %98  ;;  %v97_v60 = vpop.permute.xlu0 %96 }
  0x95   :  { %v180_v61 = vsub.f32 %v471_v13, %v97_v60  ;;  %v181_v62 = vsub.f32 %v466_v12, %v99_v58  ;;  %v119_v9 = vpop.permute.xlu2 %118 }
  0x96   :  { %v191_v12 = vsub.f32 %v539_v23, %v119_v9 }
  0x97   :  { %252 = vrot.lane.b32.xlu0 %v178_v56, %s368_s15  ;;  %256 = vrot.lane.b32.xlu2 %v180_v61, %s368_s15 }
  0x98   :  { %260 = vrot.lane.b32.xlu1 %v182_v59, %s368_s15 }
  0x9c   :  { %v105_v63 = vpop.permute.xlu1 %104  ;;  %v103_v1 = vpop.permute.xlu0 %102 }
  0x9d   :  { %v183_v3 = vsub.f32 %v492_v16, %v103_v1  ;;  %v184_v4 = vsub.f32 %v487_v15, %v105_v63  ;;  %v125_v15 = vpop.permute.xlu2 %124 }
  0x9f   :  { %258 = vrot.lane.b32.xlu0 %v181_v62, %s368_s15  ;;  %262 = vrot.lane.b32.xlu2 %v183_v3, %s368_s15 }
  0xa0   :  { %266 = vrot.lane.b32.xlu1 %v185_v0, %s368_s15 }
  0xa4   :  { %v111_v5 = vpop.permute.xlu1 %110  ;;  %v109_v7 = vpop.permute.xlu0 %108 }
  0xa5   :  { %v186_v8 = vsub.f32 %v513_v19, %v109_v7  ;;  %v187_v10 = vsub.f32 %v508_v18, %v111_v5  ;;  %v194_v19 = vsub.f32 %v560_v26, %v125_v15  ;;  %v131_v23 = vpop.permute.xlu2 %130 }
  0xa6   :  { %v197_v32 = vsub.f32 %v581_v29, %v131_v23 }
  0xa7   :  { %264 = vrot.lane.b32.xlu0 %v184_v4, %s368_s15  ;;  %268 = vrot.lane.b32.xlu2 %v186_v8, %s368_s15 }
  0xa8   :  { %272 = vrot.lane.b32.xlu1 %v188_v6, %s368_s15 }
  0xac   :  { %v117_v11 = vpop.permute.xlu1 %116  ;;  %v115_v13 = vpop.permute.xlu0 %114 }
  0xad   :  { %v189_v14 = vsub.f32 %v534_v22, %v115_v13  ;;  %v190_v16 = vsub.f32 %v529_v21, %v117_v11 }
  0xaf   :  { %270 = vrot.lane.b32.xlu0 %v187_v10, %s368_s15  ;;  %274 = vrot.lane.b32.xlu2 %v189_v14, %s368_s15 }
  0xb0   :  { %278 = vrot.lane.b32.xlu1 %v191_v12, %s368_s15 }
  0xb4   :  { %v123_v17 = vpop.permute.xlu1 %122  ;;  %v121_v20 = vpop.permute.xlu0 %120 }
  0xb5   :  { %v192_v18 = vsub.f32 %v555_v25, %v121_v20  ;;  %v193_v22 = vsub.f32 %v550_v24, %v123_v17 }
  0xb7   :  { %276 = vrot.lane.b32.xlu0 %v190_v16, %s368_s15  ;;  %280 = vrot.lane.b32.xlu2 %v192_v18, %s368_s15 }
  0xb8   :  { %284 = vrot.lane.b32.xlu1 %v194_v19, %s368_s15 }
  0xbc   :  { %v127_v33 = vpop.permute.xlu0 %126  ;;  %v129_v34 = vpop.permute.xlu1 %128 }
  0xbd   :  { %v195_v21 = vsub.f32 %v576_v28, %v127_v33  ;;  %v196_v25 = vsub.f32 %v571_v27, %v129_v34 }
  0xbf   :  { %282 = vrot.lane.b32.xlu0 %v193_v22, %s368_s15  ;;  %286 = vrot.lane.b32.xlu2 %v195_v21, %s368_s15 }
  0xc0   :  { %290 = vrot.lane.b32.xlu1 %v197_v32, %s368_s15 }
  0xc4   :  { %v133_v26 = vpop.permute.xlu0 %132  ;;  %v135_v24 = vpop.permute.xlu1 %134 }
  0xc5   :  { %v198_v35 = vsub.f32 %v597_v31, %v133_v26  ;;  %v199_v29 = vsub.f32 %v592_v30, %v135_v24 }
  0xc7   :  { %288 = vrot.lane.b32.xlu0 %v196_v25, %s368_s15  ;;  %292 = vrot.lane.b32.xlu2 %v198_v35, %s368_s15 }
  0xcf   :  { %294 = vrot.lane.b32.xlu0 %v199_v29, %s368_s15 }
  0xd1   :  { %v233_v28 = vpop.permute.xlu2 %232 }
  0xd2   :  { %329 = vst.msk [vmem:[%s796_s1] sm:$0xff] %vm328_vm0, %v233_v28 }
  0xd9   :  { %v239_v27 = vpop.permute.xlu2 %238 }
  0xda   :  { %332 = vst.msk [vmem:[%s796_s1 + $0x18] sm:$0xff] %vm328_vm0, %v239_v27 }
  0xe1   :  { %v245_v31 = vpop.permute.xlu2 %244 }
  0xe2   :  { %335 = vst.msk [vmem:[%s796_s1 + $0x30] sm:$0xff] %vm328_vm0, %v245_v31 }
  0xe9   :  { %v237_v30 = vpop.permute.xlu1 %236  ;;  %v251_v36 = vpop.permute.xlu2 %250 }
  0xea   :  { %331 = vst.msk [vmem:[%s796_s1 + $0x10] sm:$0xff] %vm328_vm0, %v237_v30 }
  0xeb   :  { %338 = vst.msk [vmem:[%s796_s1 + $0x48] sm:$0xff] %vm328_vm0, %v251_v36 }
  0xf1   :  { %v235_v37 = vpop.permute.xlu0 %234  ;;  %v257_v38 = vpop.permute.xlu2 %256 }
  0xf2   :  { %330 = vst.msk [vmem:[%s796_s1 + $0x8] sm:$0xff] %vm328_vm0, %v235_v37  ;;  %v243_v39 = vpop.permute.xlu1 %242 }
  0xf3   :  { %334 = vst.msk [vmem:[%s796_s1 + $0x28] sm:$0xff] %vm328_vm0, %v243_v39 }
  0xf4   :  { %341 = vst.msk [vmem:[%s796_s1 + $0x60] sm:$0xff] %vm328_vm0, %v257_v38 }
  0xf9   :  { %v241_v40 = vpop.permute.xlu0 %240  ;;  %v263_v41 = vpop.permute.xlu2 %262 }
  0xfa   :  { %333 = vst.msk [vmem:[%s796_s1 + $0x20] sm:$0xff] %vm328_vm0, %v241_v40  ;;  %v249_v42 = vpop.permute.xlu1 %248 }
  0xfb   :  { %337 = vst.msk [vmem:[%s796_s1 + $0x40] sm:$0xff] %vm328_vm0, %v249_v42 }
  0xfc   :  { %344 = vst.msk [vmem:[%s796_s1 + $0x78] sm:$0xff] %vm328_vm0, %v263_v41 }
 0x101   :  { %v247_v43 = vpop.permute.xlu0 %246  ;;  %v269_v44 = vpop.permute.xlu2 %268 }
 0x102   :  { %336 = vst.msk [vmem:[%s796_s1 + $0x38] sm:$0xff] %vm328_vm0, %v247_v43  ;;  %v255_v45 = vpop.permute.xlu1 %254 }
 0x103   :  { %340 = vst.msk [vmem:[%s796_s1 + $0x58] sm:$0xff] %vm328_vm0, %v255_v45 }
 0x104   :  { %347 = vst.msk [vmem:[%s796_s1 + $0x90] sm:$0xff] %vm328_vm0, %v269_v44 }
 0x109   :  { %v253_v46 = vpop.permute.xlu0 %252  ;;  %v275_v47 = vpop.permute.xlu2 %274 }
 0x10a   :  { %339 = vst.msk [vmem:[%s796_s1 + $0x50] sm:$0xff] %vm328_vm0, %v253_v46  ;;  %v261_v48 = vpop.permute.xlu1 %260 }
 0x10b   :  { %343 = vst.msk [vmem:[%s796_s1 + $0x70] sm:$0xff] %vm328_vm0, %v261_v48 }
 0x10c   :  { %350 = vst.msk [vmem:[%s796_s1 + $0xa8] sm:$0xff] %vm328_vm0, %v275_v47 }
 0x111   :  { %v259_v49 = vpop.permute.xlu0 %258  ;;  %v281_v50 = vpop.permute.xlu2 %280 }
 0x112   :  { %342 = vst.msk [vmem:[%s796_s1 + $0x68] sm:$0xff] %vm328_vm0, %v259_v49  ;;  %v267_v51 = vpop.permute.xlu1 %266 }
 0x113   :  { %346 = vst.msk [vmem:[%s796_s1 + $0x88] sm:$0xff] %vm328_vm0, %v267_v51 }
 0x114   :  { %353 = vst.msk [vmem:[%s796_s1 + $0xc0] sm:$0xff] %vm328_vm0, %v281_v50 }
 0x119   :  { %v265_v52 = vpop.permute.xlu0 %264  ;;  %v287_v53 = vpop.permute.xlu2 %286 }
 0x11a   :  { %345 = vst.msk [vmem:[%s796_s1 + $0x80] sm:$0xff] %vm328_vm0, %v265_v52  ;;  %v273_v54 = vpop.permute.xlu1 %272 }
 0x11b   :  { %349 = vst.msk [vmem:[%s796_s1 + $0xa0] sm:$0xff] %vm328_vm0, %v273_v54 }
 0x11c   :  { %356 = vst.msk [vmem:[%s796_s1 + $0xd8] sm:$0xff] %vm328_vm0, %v287_v53 }
 0x121   :  { %v271_v55 = vpop.permute.xlu0 %270  ;;  %v293_v56 = vpop.permute.xlu2 %292 }
 0x122   :  { %348 = vst.msk [vmem:[%s796_s1 + $0x98] sm:$0xff] %vm328_vm0, %v271_v55  ;;  %v279_v57 = vpop.permute.xlu1 %278 }
 0x123   :  { %352 = vst.msk [vmem:[%s796_s1 + $0xb8] sm:$0xff] %vm328_vm0, %v279_v57 }
 0x124   :  { %359 = vst.msk [vmem:[%s796_s1 + $0xf0] sm:$0xff] %vm328_vm0, %v293_v56 }
 0x129   :  { %v277_v58 = vpop.permute.xlu0 %276 }
 0x12a   :  { %351 = vst.msk [vmem:[%s796_s1 + $0xb0] sm:$0xff] %vm328_vm0, %v277_v58  ;;  %v285_v59 = vpop.permute.xlu1 %284 }
 0x12b   :  { %355 = vst.msk [vmem:[%s796_s1 + $0xd0] sm:$0xff] %vm328_vm0, %v285_v59 }
 0x131   :  { %v283_v60 = vpop.permute.xlu0 %282 }
 0x132   :  { %354 = vst.msk [vmem:[%s796_s1 + $0xc8] sm:$0xff] %vm328_vm0, %v283_v60  ;;  %v291_v61 = vpop.permute.xlu1 %290 }
 0x133   :  { %358 = vst.msk [vmem:[%s796_s1 + $0xe8] sm:$0xff] %vm328_vm0, %v291_v61 }
 0x139   :  { %v289_v62 = vpop.permute.xlu0 %288 }
 0x13a   :  { %357 = vst.msk [vmem:[%s796_s1 + $0xe0] sm:$0xff] %vm328_vm0, %v289_v62 }
 0x141   :  { %v295_v63 = vpop.permute.xlu0 %294 }
 0x142   :  { %360 = vst.msk [vmem:[%s796_s1 + $0xf8] sm:$0xff] %vm328_vm0, %v295_v63 }

</bundles_post_ra>
